<compile_context>
chip_gen: v7x
topology: tpu7x:2x2x1
jax: 0.10.0
libtpu: 0.0.40
codegen_flags: <defaults>
</compile_context>

<pallas_src>
import jax
import jax.numpy as jnp
from jax.experimental import pallas as pl
from jax.experimental.pallas import tpu as pltpu

EPS = 1e-12           # matches torch.nn.functional.normalize default eps
LANE = 128
SUBLANE = 8
NCORES = 2            # leading "parallel" grid axis (both TCs on v7x)
ROWS_TILE_MAX = 1024  # 9 planes * 1024 * 128 * 4 B = 4.5 MiB input per grid step


def _nvl_kernel(planes_ref, acc_ref):
    """One lane-dense (ROWS_TILE, 128) strip of face slots.

    planes_ref: (9, ROWS_TILE, 128) f32
        planes 0..2 : pred edge e1 = p1 - p0          (x, y, z)
        planes 3..5 : pred edge e2 = p2 - p0          (x, y, z)
        planes 6..8 : unnormalized GT face normal     (x, y, z)
    acc_ref:    (1, ROWS_TILE, 128) f32 resident per-lane partial sums.
    Padded face slots are all-zero and contribute exactly 0.
    """
    i = pl.program_id(1)

    @pl.when(i == 0)
    def _init():
        acc_ref[...] = jnp.zeros_like(acc_ref)

    def normalize(v):
        s = v[0] * v[0] + v[1] * v[1] + v[2] * v[2]
        inv = jax.lax.rsqrt(jnp.maximum(s, EPS * EPS))   # == 1 / max(||v||, eps)
        return (v[0] * inv, v[1] * inv, v[2] * inv)

    def adot(a, b):
        return jnp.abs(a[0] * b[0] + a[1] * b[1] + a[2] * b[2])

    # GT normal first: only its 3 planes are live while its normalize runs.
    n_gt = normalize((planes_ref[6], planes_ref[7], planes_ref[8]))

    e1 = (planes_ref[0], planes_ref[1], planes_ref[2])
    e2 = (planes_ref[3], planes_ref[4], planes_ref[5])
    e3 = (e2[0] - e1[0], e2[1] - e1[1], e2[2] - e1[2])   # == p2 - p1

    cos = (adot(normalize(e1), n_gt) +
           adot(normalize(e2), n_gt) +
           adot(normalize(e3), n_gt))                    # (ROWS_TILE, 128)

    acc_ref[...] += cos[None, :, :]


def normal_vector_loss(coord_out, coord_gt, face):
    """coord_out, coord_gt: (B, V, 3) float; face: (F, 3) int. Returns scalar."""
    B, V, _ = coord_out.shape
    F = face.shape[0]

    # ---- tiling: pack (batch, face) slots densely into (rows, 128) lanes ----
    total = B * F                                         # real face slots
    rows_needed = -(-total // LANE)
    rows_per_core_needed = -(-rows_needed // NCORES)      # split across cores first
    rows_tile = min(ROWS_TILE_MAX,                        # then pad each core's
                    -(-rows_per_core_needed // SUBLANE) * SUBLANE)   # share
    tiles_per_core = -(-rows_per_core_needed // rows_tile)
    rows_total = NCORES * tiles_per_core * rows_tile

    # ---- fused XLA prologue: gather + pred edges + GT cross (9 planes) ------
    # TODO(synk): the data-dependent vertex gather itself stays in XLA (fused
    # with the edge/cross math); an in-kernel SMEM-prefetched gather would
    # remove the last materialized pass but needs a per-lane dynamic gather.
    co = jnp.moveaxis(coord_out.astype(jnp.float32), -1, 0).reshape(3, B * V)
    cg = jnp.moveaxis(coord_gt.astype(jnp.float32), -1, 0).reshape(3, B * V)

    face = face.astype(jnp.int32)
    vert_off = (jnp.arange(B, dtype=jnp.int32) * V)[:, None]            # (B, 1)
    idx = [(vert_off + face[:, c][None, :]).reshape(-1) for c in range(3)]

    p0o, p1o, p2o = (jnp.take(co, i, axis=1) for i in idx)              # (3, B*F)
    p0g, p1g, p2g = (jnp.take(cg, i, axis=1) for i in idx)

    e1, e2 = p1o - p0o, p2o - p0o
    g1, g2 = p1g - p0g, p2g - p0g
    ng = jnp.stack([g1[1] * g2[2] - g1[2] * g2[1],
                    g1[2] * g2[0] - g1[0] * g2[2],
                    g1[0] * g2[1] - g1[1] * g2[0]], axis=0)             # (3, B*F)

    planes = jnp.concatenate([e1, e2, ng], axis=0)                      # (9, B*F)
    planes = jnp.pad(planes, ((0, 0), (0, rows_total * LANE - total)))
    planes = planes.reshape(9, rows_total, LANE)

    partials = pl.pallas_call(
        _nvl_kernel,
        out_shape=jax.ShapeDtypeStruct((NCORES, rows_tile, LANE), jnp.float32),
        grid=(NCORES, tiles_per_core),
        in_specs=[pl.BlockSpec((9, rows_tile, LANE),
                               lambda c, i: (0, c * tiles_per_core + i, 0))],
        out_specs=pl.BlockSpec((1, rows_tile, LANE), lambda c, i: (c, 0, 0)),
        compiler_params=pltpu.CompilerParams(
            dimension_semantics=("parallel", "arbitrary"),
            vmem_limit_bytes=32 * 1024 * 1024),
        cost_estimate=pl.CostEstimate(
            flops=60 * rows_total * LANE,
            transcendentals=4 * rows_total * LANE,
            bytes_accessed=(9 * rows_total + NCORES * rows_tile) * LANE * 4),
    )(planes)

    # Final tiny cross-lane reduce + mean over the TRUE count (3 cos per face).
    return jnp.sum(partials) / (3.0 * B * F)


def _reference_loss(coord_out, coord_gt, face):
    # Pure-JAX reproduction of the PyTorch forward, for verification.
    def norm(x):
        n = jnp.sqrt(jnp.sum(x * x, axis=2, keepdims=True))
        return x / jnp.maximum(n, EPS)

    v1o = norm(coord_out[:, face[:, 1], :] - coord_out[:, face[:, 0], :])
    v2o = norm(coord_out[:, face[:, 2], :] - coord_out[:, face[:, 0], :])
    v3o = norm(coord_out[:, face[:, 2], :] - coord_out[:, face[:, 1], :])
    v1g = norm(coord_gt[:, face[:, 1], :] - coord_gt[:, face[:, 0], :])
    v2g = norm(coord_gt[:, face[:, 2], :] - coord_gt[:, face[:, 0], :])
    ng = norm(jnp.cross(v1g, v2g, axis=2))
    cos1 = jnp.abs(jnp.sum(v1o * ng, 2, keepdims=True))
    cos2 = jnp.abs(jnp.sum(v2o * ng, 2, keepdims=True))
    cos3 = jnp.abs(jnp.sum(v3o * ng, 2, keepdims=True))
    return jnp.concatenate((cos1, cos2, cos3), axis=1).mean()


if __name__ == "__main__":
    key = jax.random.PRNGKey(0)
    k_out, k_gt, k_face = jax.random.split(key, 3)

    B, V, n_faces = 2, 16, 8
    coord_out = jax.random.normal(k_out, (B, V, 3), dtype=jnp.float32)
    coord_gt = jax.random.normal(k_gt, (B, V, 3), dtype=jnp.float32)
    # Deterministic synthetic face list (stands in for the `face` __init__ arg).
    face = jax.random.randint(k_face, (n_faces, 3), 0, V, dtype=jnp.int32)

    loss = normal_vector_loss(coord_out, coord_gt, face)
    jax.block_until_ready(loss)

    ref = _reference_loss(coord_out, coord_gt, face)
    assert abs(float(loss) - float(ref)) < 1e-4, (float(loss), float(ref))
    print("KERNEL_OK")
</pallas_src>

<mosaic_0001>
module attributes {stable_mosaic.version = 11 : i64} {
  func.func @_nvl_kernel(%arg0: i32, %arg1: i32, %arg2: memref<9x8x128xf32, #tpu.memory_space<vmem>>, %arg3: memref<1x8x128xf32, #tpu.memory_space<vmem>>) attributes {dimension_semantics = [#tpu.dimension_semantics<parallel>, #tpu.dimension_semantics<arbitrary>], iteration_bounds = array<i64: 2, 1>, scalar_prefetch = 0 : i64, scratch_operands = 0 : i64, tpu.core_type = #tpu.core_type<tc>, window_params = [{transform_indices = @transform_0, window_bounds = array<i64: 9, 8, 128>}, {transform_indices = @transform_1, window_bounds = array<i64: 1, 8, 128>}]} {
    %c0_i32 = arith.constant 0 : i32
    %0 = arith.cmpi eq, %arg1, %c0_i32 : i32
    %1 = arith.extui %0 : i1 to i32
    %c0_i32_0 = arith.constant 0 : i32
    %2 = arith.cmpi ne, %1, %c0_i32_0 : i32
    scf.if %2 {
      %cst_28 = arith.constant 0.000000e+00 : f32
      %92 = vector.broadcast %cst_28 : f32 to vector<1x8x128xf32>
      %c0_29 = arith.constant 0 : index
      %c0_30 = arith.constant 0 : index
      %c0_31 = arith.constant 0 : index
      %93 = vector.load %arg3[%c0_29, %c0_30, %c0_31] : memref<1x8x128xf32, #tpu.memory_space<vmem>>, vector<1x8x128xf32>
      tpu.vector_store %arg3[%c0_29, %c0_30, %c0_31], %92 {strides = array<i32>} : memref<1x8x128xf32, #tpu.memory_space<vmem>>, vector<1x8x128xf32>,
    } else {
    }
    %c6 = arith.constant 6 : index
    %c0 = arith.constant 0 : index
    %c0_1 = arith.constant 0 : index
    %3 = vector.load %arg2[%c6, %c0, %c0_1] : memref<9x8x128xf32, #tpu.memory_space<vmem>>, vector<1x8x128xf32>
    %4 = vector.shape_cast %3 : vector<1x8x128xf32> to vector<8x128xf32>
    %c7 = arith.constant 7 : index
    %c0_2 = arith.constant 0 : index
    %c0_3 = arith.constant 0 : index
    %5 = vector.load %arg2[%c7, %c0_2, %c0_3] : memref<9x8x128xf32, #tpu.memory_space<vmem>>, vector<1x8x128xf32>
    %6 = vector.shape_cast %5 : vector<1x8x128xf32> to vector<8x128xf32>
    %c8 = arith.constant 8 : index
    %c0_4 = arith.constant 0 : index
    %c0_5 = arith.constant 0 : index
    %7 = vector.load %arg2[%c8, %c0_4, %c0_5] : memref<9x8x128xf32, #tpu.memory_space<vmem>>, vector<1x8x128xf32>
    %8 = vector.shape_cast %7 : vector<1x8x128xf32> to vector<8x128xf32>
    %9 = arith.mulf %4, %4 : vector<8x128xf32>
    %10 = arith.mulf %6, %6 : vector<8x128xf32>
    %11 = arith.addf %9, %10 : vector<8x128xf32>
    %12 = arith.mulf %8, %8 : vector<8x128xf32>
    %13 = arith.addf %11, %12 : vector<8x128xf32>
    %cst = arith.constant 1.000000e-24 : f32
    %14 = vector.broadcast %cst : f32 to vector<8x128xf32>
    %15 = arith.maximumf %13, %14 : vector<8x128xf32>
    %16 = math.rsqrt %15 : vector<8x128xf32>
    %17 = arith.mulf %4, %16 : vector<8x128xf32>
    %18 = arith.mulf %6, %16 : vector<8x128xf32>
    %19 = arith.mulf %8, %16 : vector<8x128xf32>
    %c0_6 = arith.constant 0 : index
    %c0_7 = arith.constant 0 : index
    %c0_8 = arith.constant 0 : index
    %20 = vector.load %arg2[%c0_6, %c0_7, %c0_8] : memref<9x8x128xf32, #tpu.memory_space<vmem>>, vector<1x8x128xf32>
    %21 = vector.shape_cast %20 : vector<1x8x128xf32> to vector<8x128xf32>
    %c1 = arith.constant 1 : index
    %c0_9 = arith.constant 0 : index
    %c0_10 = arith.constant 0 : index
    %22 = vector.load %arg2[%c1, %c0_9, %c0_10] : memref<9x8x128xf32, #tpu.memory_space<vmem>>, vector<1x8x128xf32>
    %23 = vector.shape_cast %22 : vector<1x8x128xf32> to vector<8x128xf32>
    %c2 = arith.constant 2 : index
    %c0_11 = arith.constant 0 : index
    %c0_12 = arith.constant 0 : index
    %24 = vector.load %arg2[%c2, %c0_11, %c0_12] : memref<9x8x128xf32, #tpu.memory_space<vmem>>, vector<1x8x128xf32>
    %25 = vector.shape_cast %24 : vector<1x8x128xf32> to vector<8x128xf32>
    %c3 = arith.constant 3 : index
    %c0_13 = arith.constant 0 : index
    %c0_14 = arith.constant 0 : index
    %26 = vector.load %arg2[%c3, %c0_13, %c0_14] : memref<9x8x128xf32, #tpu.memory_space<vmem>>, vector<1x8x128xf32>
    %27 = vector.shape_cast %26 : vector<1x8x128xf32> to vector<8x128xf32>
    %c4 = arith.constant 4 : index
    %c0_15 = arith.constant 0 : index
    %c0_16 = arith.constant 0 : index
    %28 = vector.load %arg2[%c4, %c0_15, %c0_16] : memref<9x8x128xf32, #tpu.memory_space<vmem>>, vector<1x8x128xf32>
    %29 = vector.shape_cast %28 : vector<1x8x128xf32> to vector<8x128xf32>
    %c5 = arith.constant 5 : index
    %c0_17 = arith.constant 0 : index
    %c0_18 = arith.constant 0 : index
    %30 = vector.load %arg2[%c5, %c0_17, %c0_18] : memref<9x8x128xf32, #tpu.memory_space<vmem>>, vector<1x8x128xf32>
    %31 = vector.shape_cast %30 : vector<1x8x128xf32> to vector<8x128xf32>
    %32 = arith.subf %27, %21 : vector<8x128xf32>
    %33 = arith.subf %29, %23 : vector<8x128xf32>
    %34 = arith.subf %31, %25 : vector<8x128xf32>
    %35 = arith.mulf %21, %21 : vector<8x128xf32>
    %36 = arith.mulf %23, %23 : vector<8x128xf32>
    %37 = arith.addf %35, %36 : vector<8x128xf32>
    %38 = arith.mulf %25, %25 : vector<8x128xf32>
    %39 = arith.addf %37, %38 : vector<8x128xf32>
    %cst_19 = arith.constant 1.000000e-24 : f32
    %40 = vector.broadcast %cst_19 : f32 to vector<8x128xf32>
    %41 = arith.maximumf %39, %40 : vector<8x128xf32>
    %42 = math.rsqrt %41 : vector<8x128xf32>
    %43 = arith.mulf %21, %42 : vector<8x128xf32>
    %44 = arith.mulf %23, %42 : vector<8x128xf32>
    %45 = arith.mulf %25, %42 : vector<8x128xf32>
    %46 = arith.mulf %43, %17 : vector<8x128xf32>
    %47 = arith.mulf %44, %18 : vector<8x128xf32>
    %48 = arith.addf %46, %47 : vector<8x128xf32>
    %49 = arith.mulf %45, %19 : vector<8x128xf32>
    %50 = arith.addf %48, %49 : vector<8x128xf32>
    %51 = math.absf %50 : vector<8x128xf32>
    %52 = arith.mulf %27, %27 : vector<8x128xf32>
    %53 = arith.mulf %29, %29 : vector<8x128xf32>
    %54 = arith.addf %52, %53 : vector<8x128xf32>
    %55 = arith.mulf %31, %31 : vector<8x128xf32>
    %56 = arith.addf %54, %55 : vector<8x128xf32>
    %cst_20 = arith.constant 1.000000e-24 : f32
    %57 = vector.broadcast %cst_20 : f32 to vector<8x128xf32>
    %58 = arith.maximumf %56, %57 : vector<8x128xf32>
    %59 = math.rsqrt %58 : vector<8x128xf32>
    %60 = arith.mulf %27, %59 : vector<8x128xf32>
    %61 = arith.mulf %29, %59 : vector<8x128xf32>
    %62 = arith.mulf %31, %59 : vector<8x128xf32>
    %63 = arith.mulf %60, %17 : vector<8x128xf32>
    %64 = arith.mulf %61, %18 : vector<8x128xf32>
    %65 = arith.addf %63, %64 : vector<8x128xf32>
    %66 = arith.mulf %62, %19 : vector<8x128xf32>
    %67 = arith.addf %65, %66 : vector<8x128xf32>
    %68 = math.absf %67 : vector<8x128xf32>
    %69 = arith.addf %51, %68 : vector<8x128xf32>
    %70 = arith.mulf %32, %32 : vector<8x128xf32>
    %71 = arith.mulf %33, %33 : vector<8x128xf32>
    %72 = arith.addf %70, %71 : vector<8x128xf32>
    %73 = arith.mulf %34, %34 : vector<8x128xf32>
    %74 = arith.addf %72, %73 : vector<8x128xf32>
    %cst_21 = arith.constant 1.000000e-24 : f32
    %75 = vector.broadcast %cst_21 : f32 to vector<8x128xf32>
    %76 = arith.maximumf %74, %75 : vector<8x128xf32>
    %77 = math.rsqrt %76 : vector<8x128xf32>
    %78 = arith.mulf %32, %77 : vector<8x128xf32>
    %79 = arith.mulf %33, %77 : vector<8x128xf32>
    %80 = arith.mulf %34, %77 : vector<8x128xf32>
    %81 = arith.mulf %78, %17 : vector<8x128xf32>
    %82 = arith.mulf %79, %18 : vector<8x128xf32>
    %83 = arith.addf %81, %82 : vector<8x128xf32>
    %84 = arith.mulf %80, %19 : vector<8x128xf32>
    %85 = arith.addf %83, %84 : vector<8x128xf32>
    %86 = math.absf %85 : vector<8x128xf32>
    %87 = arith.addf %69, %86 : vector<8x128xf32>
    %c0_22 = arith.constant 0 : index
    %c0_23 = arith.constant 0 : index
    %c0_24 = arith.constant 0 : index
    %88 = vector.load %arg3[%c0_22, %c0_23, %c0_24] : memref<1x8x128xf32, #tpu.memory_space<vmem>>, vector<1x8x128xf32>
    %89 = vector.shape_cast %87 : vector<8x128xf32> to vector<1x8x128xf32>
    %90 = arith.addf %88, %89 : vector<1x8x128xf32>
    %c0_25 = arith.constant 0 : index
    %c0_26 = arith.constant 0 : index
    %c0_27 = arith.constant 0 : index
    %91 = vector.load %arg3[%c0_25, %c0_26, %c0_27] : memref<1x8x128xf32, #tpu.memory_space<vmem>>, vector<1x8x128xf32>
    tpu.vector_store %arg3[%c0_25, %c0_26, %c0_27], %90 {strides = array<i32>} : memref<1x8x128xf32, #tpu.memory_space<vmem>>, vector<1x8x128xf32>,
    return
  }
  func.func @transform_0(%arg0: i32, %arg1: i32) -> (i32, i32, i32) {
    %c1_i32 = arith.constant 1 : i32
    %0 = arith.muli %arg0, %c1_i32 : i32
    %1 = arith.addi %0, %arg1 : i32
    %c0_i32 = arith.constant 0 : i32
    %c0_i32_0 = arith.constant 0 : i32
    %c0_i32_1 = arith.constant 0 : i32
    return %c0_i32, %1, %c0_i32_0 : i32, i32, i32
  }
  func.func @transform_1(%arg0: i32, %arg1: i32) -> (i32, i32, i32) {
    %c0_i32 = arith.constant 0 : i32
    %c0_i32_0 = arith.constant 0 : i32
    %c0_i32_1 = arith.constant 0 : i32
    return %arg0, %c0_i32, %c0_i32_0 : i32, i32, i32
  }
}

</mosaic_0001>

<bundles_post_ra>
// kernel: tpu_custom_call.1
= control target key start
LH: loop header
LB: loop body
LE: loop exit
PB: predicated region body
PF: predicated region fallthrough
CT: control target
= control target key end

     0   :  { %6 = vsyncpa [#allocation3], 0  ;;  %s727_s0 = inlined_call_operand.hbm [shape: f32[9,16,128], index: 0, kind: input, shape index: {}]   ;;  %s728_s1 = inlined_call_operand.hbm [shape: f32[2,8,128], index: 1, kind: output, shape index: {}]  }
   0x1   :  { %8 = vsyncpa [#allocation3 + $0x1], 0 }
   0x2   :  { %9 = vsyncpa [#allocation4], 0 }
   0x3   :  { %11 = vsyncpa [#allocation4 + $0x1], 0  ;;  %s555_s6 = smov 0   ;;  %s557_s7 = smov 0  }
   0x4   :  { %s559_s8 = smov 0   ;;  %s561_s9 = smov 0  }
   0x5   :  { %s563_s10 = smov 0   ;;  %s565_s11 = smov 0  }
   0x6 LB: > { %s331_s12 = sadd.s32 4294967295, %s538_s11   ;;  %s332_s13 = sadd.s32 4294967294, %s538_s11   ;;  %s538_s11 = sphi %s565_s11, %s17_s11   ;;  %s534_s10 = sphi %s563_s10, %s742_s10   ;;  %s530_s9 = sphi %s561_s9, %s741_s9   ;;  %s526_s8 = sphi %s559_s8, %s740_s8   ;;  %s522_s7 = sphi %s557_s7, %s739_s7   ;;  %s518_s6 = sphi %s555_s6, %s738_s6  }
   0x7   : > { %s29_s14 = sadd.s32 1, %s534_s10  ;;  %s38_s15 = sadd.s32 1, %s526_s8 }
   0x8   : > { %p31_p0 = scmp.ge.s32.totalorder %s29_s14, 2  ;;  %p45_p1 = scmp.ne.s32.totalorder %s526_s8, %s522_s7 }
   0x9   : > { %p46_p2 = scmp.eq.s32.totalorder %s538_s11, 0  ;;  %p51_p3 = scmp.ne.s32.totalorder %s522_s7, %s518_s6 }
   0xa   : > { %s744_s14 = smov (%p31_p0, %s29_s14), 0  ;;  %p52_p5 = scmp.eq.s32.totalorder %s331_s12, 0 }
   0xb   : > { %p596_p4 = por %p46_p2, %p45_p1  ;;  %s35_s17 = ssub.s32 %s534_s10, %s744_s14 }
   0xc   : > { %p75_p6 = scmp.eq.s32.totalorder %s331_s12, 1  ;;  %p36_p7 = scmp.eq.s32.totalorder %s35_s17, 0 }
   0xd   : > { %p602_p8 = por %p52_p5, %p51_p3  ;;  %p81_p10 = scmp.eq.s32.totalorder %s332_s13, 1 }
   0xe   : > { %p606_p9 = por %p75_p6, %p45_p1  ;;  %p364_p13 = scmp.lt.s32.totalorder %s538_s11, 2 }
   0xf   : > { %s611_s20 = scalar_select %p36_p7, %s526_s8, %s38_s15  }
  0x10   : > { %s732_s19 = scalar_select %p606_p9, 1, 0 }
  0x11   : > { %p613_p11 = por %p81_p10, %p51_p3  ;;  %s101_s22 = sand.u32 1, %s526_s8  }
  0x12   : > { %s350_s23 = smul.u32 72, %s101_s22  ;;  %s335_s24 = sshll.u32 %s534_s10, 7 }
  0x13   : > { %s733_s21 = scalar_select %p613_p11, 1, 0 }
  0x14   : > { %p623_p0 = pnand %p364_p13, %p596_p4  ;;  %s630_s28 = scalar_lea.hbm %s727_s0, %s335_s24 }
  0x15   : > { %s105_s29 = scalar_lea.vmem [#allocation2], %s350_s23  ;;  %s634_s2 = scalar_lea.sflag [#allocation3], %s101_s22 }
  0x16   : > { %s112_s30 = sshll.u32 %s105_s29, 4  ;;  %s426_s3 = scalar_lea.hbm %s630_s28, 1152  ;;  %s632_s30 = int_to_ptr.vmem [resolvable:$true] %s112_s30 }
  0x17   : > { %p427_p1 = scmp.ne.s32.totalorder %s630_s28, %s426_s3  ;;  %p428_p2 = pneg %p623_p0 }
  0x18   : > { %s431_s12 = scalar_lea.hbm %s727_s0, 2304  ;;  %p432_p5 = scmp.lt.u32.totalorder %s630_s28, %s727_s0 }
  0x19   : > { %p429_p3 = pnand %p428_p2, %p427_p1  ;;  %p433_p6 = scmp.lt.u32.totalorder %s431_s12, %s426_s3 }
  0x1a   : > { %p435_p10 = scmp.lt.u32.totalorder %s426_s3, %s630_s28 }
  0x1b   : > { %p430_p4 = pneg %p429_p3  ;;  %p434_p7 = por %p433_p6, %p432_p5 }
  0x1d   : > { %p436_p13 = por %p435_p10, %p434_p7 }
  0x1f   : > { %p437_p12 = pnand %p436_p13, %p430_p4 }
  0x21   : > { %440 = shalt.err (!%p437_p12)
}
  0x22   : > { %s441_s16 = scalar_lea.vmem %s632_s30, 1152  ;;  %s540_s17 = smov [#allocation2]  }
  0x23   : > { %p442_p1 = scmp.ne.s32.totalorder %s632_s30, %s441_s16  ;;  %s446_s22 = sshll.u32 %s540_s17, 4  ;;  %s447_s22 = int_to_ptr.vmem [resolvable:$false] %s446_s22 }
  0x24   : > { %s448_s23 = scalar_lea.vmem %s447_s22, 2304  ;;  %p449_p9 = scmp.lt.s32.totalorder %s632_s30, %s447_s22 }
  0x25   : > { %p444_p3 = pnand %p442_p1, %p428_p2  ;;  %p450_p5 = scmp.lt.s32.totalorder %s448_s23, %s441_s16 }
  0x27   : > { %p445_p11 = pneg %p444_p3  ;;  %p451_p6 = por %p450_p5, %p449_p9 }
  0x29   : > { %p452_p7 = pnand %p451_p6, %p445_p11 }
  0x2b   : > { %455 = shalt.err (!%p452_p7)
}
  0x2c   : > { %s541_s24 = smov 256   ;;  %s542_s26 = smov 128  }
  0x2d   : > { %s543_s27 = smov 8   ;;  %p336_p12 = scmp.ge.s32.totalorder %s538_s11, 1 }
  0x2e   : > { %359 = dma.hbm_to_vmem [thread:$0]  (!%p623_p0), %s630_s28, 1152, %s632_s30, %s634_s2, %s541_s24, %s542_s26, %s543_s27  }
  0x2f   : > { %p120_p2 = scmp.lt.s32.totalorder %s538_s11, 3 }
  0x31   : > { %p121_p4 = pnand %p336_p12, %p120_p2 }
  0x32   : > { %s665_s29 = sand.u32 (!%p121_p4), 1, %s522_s7  }
  0x33   : > { %124 = sbr.rel (%p121_p4) target bundleno = 111 (0x6f), region = 24  ;;  %s127_s4 = scalar_lea.sflag (!%p121_p4), [#allocation3], %s665_s29 }
  0x34   : > { %s351_s3 = smul.u32 (!%p121_p4), 72, %s665_s29 }
  0x36   : > { %s130_s5 = scalar_lea.vmem (!%p121_p4), [#allocation2], %s351_s3 }
  0x3a   : > { %509 = dma.done.wait (%p602_p8), %s127_s4, 1152  }
  0x3b   : > { %511 = vsyncadd (%p602_p8), %s127_s4, 4294966144  ;;  %v338_v0 = vld [vmem:[%s130_s5 + $0x30] sm:$0xff]  ;;  %v339_v1 = vld [vmem:[%s130_s5 + $0x38] sm:$0xff]  ;;  %s337_s18 = sshll.u32 %s665_s29, 3  ;;  %s347_s25 = sshll.u32 %s530_s9, 7 }
  0x3c   : > { %v340_v2 = vld [vmem:[%s130_s5 + $0x40] sm:$0xff]  ;;  %v161_v3 = vmul.f32 %v338_v0, %v338_v0  ;;  %v162_v4 = vmul.f32 %v339_v1, %v339_v1  ;;  %v341_v7 = vld [vmem:[%s130_s5 + $0x8] sm:$0xff]  ;;  %v342_v8 = vld [vmem:[%s130_s5 + $0x10] sm:$0xff]  ;;  %s148_s28 = scalar_lea.vmem [#allocation5], %s337_s18  ;;  %s678_s13 = scalar_lea.hbm %s728_s1, %s347_s25 }
  0x3d   : > { %v164_v5 = vmul.f32 %v340_v2, %v340_v2  ;;  %v171_v6 = vld [vmem:[%s130_s5] sm:$0xff]  ;;  %v343_v9 = vld [vmem:[%s130_s5 + $0x18] sm:$0xff]  ;;  %v345_v11 = vld [vmem:[%s130_s5 + $0x28] sm:$0xff]  ;;  %v186_v13 = vmul.f32 %v341_v7, %v341_v7  ;;  %v188_v14 = vmul.f32 %v342_v8, %v342_v8  ;;  %s252_s30 = sshll.u32 %s148_s28, 4  ;;  %s239_s15 = scalar_lea.sflag [#allocation4], %s665_s29  ;;  %s680_s30 = int_to_ptr.vmem [resolvable:$true] %s252_s30 }
  0x3e   : > { %v344_v10 = vld [vmem:[%s130_s5 + $0x20] sm:$0xff]  ;;  %v185_v12 = vmul.f32 %v171_v6, %v171_v6  ;;  %v163_v15 = vadd.f32 %v162_v4, %v161_v3  ;;  %v182_v16 = vsub.f32 %v343_v9, %v171_v6  ;;  %v184_v18 = vsub.f32 %v345_v11, %v342_v8  ;;  %s456_s16 = scalar_lea.vmem %s680_s30, 128  ;;  %p735_p9 = scmp.ne.s32.totalorder %s732_s19, 0 }
  0x3f   : > { %v183_v17 = vsub.f32 %v344_v10, %v341_v7  ;;  %v201_v20 = vmul.f32 %v343_v9, %v343_v9  ;;  %v202_v21 = vmul.f32 %v344_v10, %v344_v10  ;;  %v204_v22 = vmul.f32 %v345_v11, %v345_v11  ;;  %p457_p8 = scmp.ne.s32.totalorder %s680_s30, %s456_s16  ;;  %s544_s9 = smov [#allocation5]  }
  0x40   : > { %v187_v19 = vadd.f32 %v186_v13, %v185_v12  ;;  %v165_v23 = vadd.f32 %v164_v5, %v163_v15  ;;  %v218_v24 = vmul.f32 %v182_v16, %v182_v16  ;;  %v221_v26 = vmul.f32 %v184_v18, %v184_v18  ;;  %s460_s17 = sshll.u32 %s544_s9, 4  ;;  %s461_s17 = int_to_ptr.vmem [resolvable:$false] %s460_s17 }
  0x41   : > { %v219_v25 = vmul.f32 %v183_v17, %v183_v17  ;;  %v203_v28 = vadd.f32 %v202_v21, %v201_v20  ;;  %p458_p11 = pnand %p457_p8, %p735_p9  ;;  %s462_s22 = scalar_lea.vmem %s461_s17, 256 }
  0x42   : > { %v189_v27 = vadd.f32 %v188_v14, %v187_v19  ;;  %v166_v29 = vmax.f32 %v165_v23, 1e-24  ;;  %p463_p10 = scmp.lt.s32.totalorder %s680_s30, %s461_s17  ;;  %p464_p13 = scmp.lt.s32.totalorder %s462_s22, %s456_s16 }
  0x43   : > { %v220_v30 = vadd.f32 %v219_v25, %v218_v24  ;;  %v205_v32 = vadd.f32 %v204_v22, %v203_v28  ;;  %p459_p0 = pneg %p458_p11 }
  0x44   : > { %v190_v31 = vmax.f32 %v189_v27, 1e-24  ;;  %418 = vrsqrt.f32 %v166_v29  ;;  %p465_p1 = por %p464_p13, %p463_p10 }
  0x45   : > { %v222_v33 = vadd.f32 %v221_v26, %v220_v30  ;;  %v206_v34 = vmax.f32 %v205_v32, 1e-24 }
  0x46   : > { %420 = vrsqrt.f32 %v190_v31  ;;  %p466_p3 = pnand %p465_p1, %p459_p0 }
  0x47   : > { %v223_v35 = vmax.f32 %v222_v33, 1e-24  ;;  %422 = vrsqrt.f32 %v206_v34 }
  0x49   : > { %424 = vrsqrt.f32 %v223_v35 }
  0x4e   : > { %v419_v36 = vpop.eup %418 }
  0x4f   : > { %v168_v38 = vmul.f32 %v419_v36, %v338_v0  ;;  %v169_v39 = vmul.f32 %v419_v36, %v339_v1  ;;  %v170_v40 = vmul.f32 %v419_v36, %v340_v2 }
  0x50   : > { %v421_v37 = vpop.eup %420 }
  0x51   : > { %v192_v41 = vmul.f32 %v421_v37, %v171_v6  ;;  %v193_v42 = vmul.f32 %v421_v37, %v341_v7  ;;  %v194_v43 = vmul.f32 %v421_v37, %v342_v8  ;;  %v423_v44 = vpop.eup %422 }
  0x52   : > { %v208_v49 = vmul.f32 %v423_v44, %v343_v9  ;;  %v209_v50 = vmul.f32 %v423_v44, %v344_v10  ;;  %v210_v51 = vmul.f32 %v423_v44, %v345_v11 }
  0x53   : > { %v425_v45 = vpop.eup %424  ;;  %v195_v46 = vmul.f32 %v192_v41, %v168_v38  ;;  %v196_v47 = vmul.f32 %v193_v42, %v169_v39  ;;  %v198_v48 = vmul.f32 %v194_v43, %v170_v40 }
  0x54   : > { %v225_v52 = vmul.f32 %v425_v45, %v182_v16  ;;  %v226_v53 = vmul.f32 %v425_v45, %v183_v17  ;;  %v211_v55 = vmul.f32 %v208_v49, %v168_v38  ;;  %v227_v56 = vmul.f32 %v425_v45, %v184_v18 }
  0x55   : > { %v197_v54 = vadd.f32 %v196_v47, %v195_v46  ;;  %v212_v57 = vmul.f32 %v209_v50, %v169_v39  ;;  %v214_v58 = vmul.f32 %v210_v51, %v170_v40 }
  0x56   : > { %v228_v59 = vmul.f32 %v225_v52, %v168_v38  ;;  %v229_v60 = vmul.f32 %v226_v53, %v169_v39  ;;  %v231_v62 = vmul.f32 %v227_v56, %v170_v40 }
  0x57   : > { %v199_v61 = vadd.f32 %v198_v48, %v197_v54  ;;  %v213_v63 = vadd.f32 %v212_v57, %v211_v55 }
  0x58   : > { %v230_v0 = vadd.f32 %v229_v60, %v228_v59 }
  0x59   : > { %v200_v1 = vand.u32 2147483647, %v199_v61  ;;  %v215_v2 = vadd.f32 %v214_v58, %v213_v63 }
  0x5a   : > { %v232_v3 = vadd.f32 %v231_v62, %v230_v0 }
  0x5b   : > { %v216_v4 = vand.u32 2147483647, %v215_v2 }
  0x5c   : > { %v233_v5 = vand.u32 2147483647, %v232_v3 }
  0x5d   : > { %v217_v6 = vadd.f32 %v216_v4, %v200_v1 }
  0x5f   : > { %v234_v7 = vadd.f32 %v233_v5, %v217_v6 }
  0x61   : > { %237 = vst [vmem:[%s148_s28] sm:$0xff] %v234_v7 }
  0x62   : > { %469 = shalt.err (!%p466_p3)
}
  0x63   : > { %s470_s23 = scalar_lea.hbm %s678_s13, 128  ;;  %s474_s27 = scalar_lea.hbm %s728_s1, 256 }
  0x64   : > { %p471_p5 = scmp.ne.s32.totalorder %s678_s13, %s470_s23  ;;  %p475_p12 = scmp.lt.u32.totalorder %s678_s13, %s728_s1 }
  0x65   : > { %p476_p2 = scmp.lt.u32.totalorder %s474_s27, %s470_s23  ;;  %p478_p8 = scmp.lt.u32.totalorder %s470_s23, %s678_s13 }
  0x66   : > { %p472_p6 = pnand %p471_p5, %p735_p9 }
  0x67   : > { %p477_p4 = por %p476_p2, %p475_p12 }
  0x68   : > { %p473_p7 = pneg %p472_p6 }
  0x69   : > { %p479_p11 = por %p478_p8, %p477_p4 }
  0x6b   : > { %p480_p0 = pnand %p479_p11, %p473_p7 }
  0x6d   : > { %483 = shalt.err (!%p480_p0)
}
  0x6e   : > { %354 = dma.vmem_to_hbm [thread:$0]  (%p735_p9), %s680_s30, 128, %s678_s13, %s239_s15  }
  0x6f PF: > { %s264_s4 = sand.u32 1, %s518_s6   ;;  %p736_p10 = scmp.ne.s32.totalorder %s733_s21, 0 }
  0x70   : > { %p737_p13 = scmp.ge.s32.totalorder %s538_s11, 2  ;;  %s265_s5 = scalar_lea.sflag [#allocation4], %s264_s4 }
  0x72   : > { %p361_p1 = pnand %p737_p13, %p736_p10 }
  0x74   : > { %513 = dma.done.wait (!%p361_p1), %s265_s5, 128  }
  0x75   : > { %515 = vsyncadd (!%p361_p1), %s265_s5, 4294967168  ;;  %s17_s11 = sadd.s32 1, %s538_s11   ;;  %s738_s6 = smov %s522_s7 }
  0x76   : > { %p14_p3 = scmp.ge.s32.totalorder %s17_s11, 4   ;;  %s739_s7 = smov %s526_s8 }
  0x77   : > { %s740_s8 = smov %s611_s20  ;;  %s741_s9 = smov %s534_s10 }
  0x78   : > { %s742_s10 = smov %s744_s14  ;;  %16 = sbr.rel (!%p14_p3) target bundleno = 6 (0x6), region = 81 }
  0x7f   :  { %270 = vsyncpa [#allocation3], 1 }
  0x80   :  { %272 = vsyncpa [#allocation3 + $0x1], 1 }
  0x81   :  { %273 = vsyncpa [#allocation4], 1 }
  0x82   :  { %275 = vsyncpa [#allocation4 + $0x1], 1 }

</bundles_post_ra>
